<compile_context>
chip_gen: v5e
topology: v5e:2x2
jax: 0.10.0
libtpu: 0.0.40
codegen_flags: <defaults>
</compile_context>

<pallas_src>
import math

import jax
import jax.numpy as jnp
from jax.experimental import pallas as pl
from jax.experimental.pallas import tpu as pltpu

_C = math.sqrt(2.0 / math.pi)          # sqrt(2/pi)
_C3 = _C * 0.044715                    # folded cubic coefficient


def _bias_new_gelu_kernel(x_ref, b_ref, o_ref):
    # Elementwise hot path: bias add + tanh-based "new GELU", fused in one pass.
    x = x_ref[...].astype(jnp.float32)
    b = b_ref[...].astype(jnp.float32)        # (1, tn) -> broadcast over rows
    y = x + b
    y2 = y * y
    inner = y * (_C + _C3 * y2)               # = C*(y + 0.044715*y^3)
    t = jnp.tanh(inner)                       # EUP slot (effectively free)
    half_y = 0.5 * y
    o_ref[...] = (half_y + half_y * t).astype(o_ref.dtype)


def _round_up(x, m):
    return ((x + m - 1) // m) * m


def _pick_tn(width, cap=2048):
    """Largest multiple-of-128 block that evenly divides `width` (lane-dense)."""
    if width % 128 != 0:
        # Full-width block (== full array dim) is the only legal choice; tail
        # lanes get masked stores.
        # TODO(synk): could pad hidden once at init-time to kill the mask.
        return width
    if width <= cap:
        return width
    for tn in range(cap - (cap % 128), 127, -128):
        if width % tn == 0:
            return tn
    return 128


def fused_bias_new_gelu(x, bias, *, block_bytes=2 << 20, lane_cap=2048):
    """x: (..., hidden), bias: (hidden,). Returns new_gelu(x + bias), same shape/dtype."""
    orig_shape = x.shape
    hidden = orig_shape[-1]
    assert bias.shape == (hidden,), (bias.shape, hidden)
    dtype = x.dtype
    itemsize = jnp.dtype(dtype).itemsize
    total = math.prod(orig_shape)
    rows = total // hidden

    # ------------------------------------------------------------------
    # Build a lane-dense 2-D view (R, W) with a (1, W) bias row that
    # broadcasts correctly over every row of that view.
    # ------------------------------------------------------------------
    if hidden % 128 == 0:
        R, W = rows, hidden
        x2 = x.reshape(R, W)
        b2 = bias.reshape(1, W)
    else:
        # Fold rows into the lane axis: W = lcm(hidden, 128).  Every folded
        # row then covers exactly W//hidden complete original rows, so the
        # bias pattern tiles exactly and stores stay unmasked.
        W = (hidden * 128) // math.gcd(hidden, 128)
        if W <= (1 << 16) and total % W == 0:
            R = total // W
            x2 = x.reshape(R, W)
            b2 = jnp.tile(bias, W // hidden).reshape(1, W)
        else:
            # Fallback: full-hidden last dim (masked tail lanes, still correct).
            R, W = rows, hidden
            x2 = x.reshape(R, W)
            b2 = bias.reshape(1, W)

    # ------------------------------------------------------------------
    # Tile selection: lane tile tn (multiple of 128 dividing W when possible),
    # row tile tm sized so one block is ~block_bytes.
    # ------------------------------------------------------------------
    tn = _pick_tn(W, cap=lane_cap)

    if R <= 8:
        tm = R                                  # full first dim (always legal)
    else:
        tm = max(8, (block_bytes // max(1, tn * itemsize)) // 8 * 8)
        tm = min(tm, _round_up(R, 8))
        # Keep at least 2 row steps so megacore can split work across cores.
        if pl.cdiv(R, tm) < 2:
            tm = max(8, _round_up(pl.cdiv(R, 2), 8))

    grid = (pl.cdiv(R, tm), pl.cdiv(W, tn))     # rows outer, hidden inner

    n_elems = R * W
    cost = pl.CostEstimate(
        flops=9 * n_elems,
        transcendentals=n_elems,
        bytes_accessed=2 * x2.size * itemsize + b2.size * itemsize,
    )

    out2 = pl.pallas_call(
        _bias_new_gelu_kernel,
        out_shape=jax.ShapeDtypeStruct((R, W), dtype),
        grid_spec=pltpu.PrefetchScalarGridSpec(
            num_scalar_prefetch=0,
            grid=grid,
            in_specs=[
                pl.BlockSpec((tm, tn), lambda i, j: (i, j)),
                pl.BlockSpec((1, tn), lambda i, j: (0, j)),
            ],
            out_specs=pl.BlockSpec((tm, tn), lambda i, j: (i, j)),
        ),
        compiler_params=pltpu.CompilerParams(
            dimension_semantics=("parallel", "parallel"),
            vmem_limit_bytes=32 * 1024 * 1024,
        ),
        cost_estimate=cost,
    )(x2, b2)

    return out2.reshape(orig_shape)


def _reference(x, bias):
    y = x.astype(jnp.float32) + bias.astype(jnp.float32)
    out = 0.5 * y * (1.0 + jnp.tanh(_C * (y + 0.044715 * jnp.power(y, 3.0))))
    return out.astype(x.dtype)


if __name__ == "__main__":
    key = jax.random.PRNGKey(0)
    kx, kb, kx2, kb2 = jax.random.split(key, 4)

    # Primary small test: (batch, seq, hidden) = (2, 8, 32), matching the module.
    batch, seq, hidden = 2, 8, 32
    x = jax.random.normal(kx, (batch, seq, hidden), dtype=jnp.float32)
    # Matches torch.nn.init.uniform_(bias, 0, 1) in reset_parameters (no prev_weight).
    bias = jax.random.uniform(kb, (hidden,), dtype=jnp.float32, minval=0.0, maxval=1.0)

    out = fused_bias_new_gelu(x, bias)
    out = jax.block_until_ready(out)
    ref = _reference(x, bias)
    assert out.shape == x.shape and out.dtype == x.dtype
    assert jnp.allclose(out, ref, atol=1e-5, rtol=1e-5)

    # Secondary check: non-divisible row count + 128-multiple hidden, to
    # exercise the un-padded edge-block (masked row writeback) path.
    x_b = jax.random.normal(kx2, (3, 7, 256), dtype=jnp.float32)
    bias_b = jax.random.uniform(kb2, (256,), dtype=jnp.float32, minval=0.0, maxval=1.0)
    out_b = jax.block_until_ready(fused_bias_new_gelu(x_b, bias_b))
    assert jnp.allclose(out_b, _reference(x_b, bias_b), atol=1e-5, rtol=1e-5)

    print("KERNEL_OK")
</pallas_src>

<mosaic_0001>
module attributes {stable_mosaic.version = 11 : i64} {
  func.func @_bias_new_gelu_kernel(%arg0: i32, %arg1: i32, %arg2: memref<4x128xf32, #tpu.memory_space<vmem>>, %arg3: memref<1x128xf32, #tpu.memory_space<vmem>>, %arg4: memref<4x128xf32, #tpu.memory_space<vmem>>) attributes {dimension_semantics = [#tpu.dimension_semantics<parallel>, #tpu.dimension_semantics<parallel>], iteration_bounds = array<i64: 1, 1>, scalar_prefetch = 0 : i64, scratch_operands = 0 : i64, tpu.core_type = #tpu.core_type<tc>, window_params = [{transform_indices = @transform_0, window_bounds = array<i64: 4, 128>}, {transform_indices = @transform_1, window_bounds = array<i64: 1, 128>}, {transform_indices = @transform_2, window_bounds = array<i64: 4, 128>}]} {
    %c0 = arith.constant 0 : index
    %c0_0 = arith.constant 0 : index
    %0 = vector.load %arg2[%c0, %c0_0] : memref<4x128xf32, #tpu.memory_space<vmem>>, vector<4x128xf32>
    %c0_1 = arith.constant 0 : index
    %c0_2 = arith.constant 0 : index
    %1 = vector.load %arg3[%c0_1, %c0_2] : memref<1x128xf32, #tpu.memory_space<vmem>>, vector<1x128xf32>
    %2 = vector.broadcast %1 : vector<1x128xf32> to vector<4x128xf32>
    %3 = arith.addf %0, %2 : vector<4x128xf32>
    %4 = arith.mulf %3, %3 : vector<4x128xf32>
    %cst = arith.constant 0.0356774069 : f32
    %5 = vector.broadcast %cst : f32 to vector<4x128xf32>
    %6 = arith.mulf %5, %4 : vector<4x128xf32>
    %cst_3 = arith.constant 0.797884583 : f32
    %7 = vector.broadcast %cst_3 : f32 to vector<4x128xf32>
    %8 = arith.addf %7, %6 : vector<4x128xf32>
    %9 = arith.mulf %3, %8 : vector<4x128xf32>
    %10 = math.tanh %9 : vector<4x128xf32>
    %cst_4 = arith.constant 5.000000e-01 : f32
    %11 = vector.broadcast %cst_4 : f32 to vector<4x128xf32>
    %12 = arith.mulf %11, %3 : vector<4x128xf32>
    %13 = arith.mulf %12, %10 : vector<4x128xf32>
    %14 = arith.addf %12, %13 : vector<4x128xf32>
    %c0_5 = arith.constant 0 : index
    %c0_6 = arith.constant 0 : index
    %15 = vector.load %arg4[%c0_5, %c0_6] : memref<4x128xf32, #tpu.memory_space<vmem>>, vector<4x128xf32>
    tpu.vector_store %arg4[%c0_5, %c0_6], %14 {strides = array<i32>} : memref<4x128xf32, #tpu.memory_space<vmem>>, vector<4x128xf32>,
    return
  }
  func.func @transform_0(%arg0: i32, %arg1: i32) -> (i32, i32) {
    %c0_i32 = arith.constant 0 : i32
    return %arg0, %arg1 : i32, i32
  }
  func.func @transform_1(%arg0: i32, %arg1: i32) -> (i32, i32) {
    %c0_i32 = arith.constant 0 : i32
    %c0_i32_0 = arith.constant 0 : i32
    return %c0_i32, %arg1 : i32, i32
  }
  func.func @transform_2(%arg0: i32, %arg1: i32) -> (i32, i32) {
    %c0_i32 = arith.constant 0 : i32
    return %arg0, %arg1 : i32, i32
  }
}

</mosaic_0001>

<bundles_post_ra>
// kernel: tpu_custom_call.1
= control target key start
LH: loop header
LB: loop body
LE: loop exit
PB: predicated region body
PF: predicated region fallthrough
CT: control target
= control target key end

     0   :  { %7 = vsyncpa [#allocation3], 0  ;;  %s184_s0 = inlined_call_operand.hbm [shape: f32[4,128], index: 0, kind: input, shape index: {}]   ;;  %s185_s1 = inlined_call_operand.hbm [shape: f32[1,128], index: 1, kind: input, shape index: {}]   ;;  %s186_s2 = inlined_call_operand.hbm [shape: f32[4,128], index: 2, kind: output, shape index: {}]  }
   0x1   :  { %8 = vsyncpa [#allocation6], 0 }
   0x2   :  { %9 = vsyncpa [#allocation4], 0  ;;  %s15_s11 = sshll.u32 %s184_s0, 4  ;;  %s157_s12 = smov [#allocation2]   ;;  %s16_s11 = int_to_ptr.hbm [resolvable:$true] %s15_s11 }
   0x3   :  { %s17_s13 = sshll.u32 %s157_s12, 4  ;;  %s26_s16 = sshll.u32 %s185_s1, 4  ;;  %s18_s13 = int_to_ptr.vmem [resolvable:$true] %s17_s13  ;;  %s27_s16 = int_to_ptr.hbm [resolvable:$true] %s26_s16 }
   0x4   :  { %20 = dma.hbm_to_vmem [thread:$0]  %s16_s11, 64, %s18_s13, [#allocation3]  }
   0x5   :  { %s158_s17 = smov [#allocation5]  }
   0x6   :  { %s28_s18 = sshll.u32 %s158_s17, 4  ;;  %s29_s18 = int_to_ptr.vmem [resolvable:$true] %s28_s18 }
   0x7   :  { %31 = dma.hbm_to_vmem [thread:$0]  %s27_s16, 16, %s29_s18, [#allocation6]  }
   0x8   :  { %151 = dma.done.wait [#allocation3], 64  }
   0x9   :  { %152 = vsyncadd [#allocation3], 4294967232 }
   0xa   :  { %153 = dma.done.wait [#allocation6], 16  }
   0xb   :  { %154 = vsyncadd [#allocation6], 4294967280  ;;  %v40_v0 = vld [vmem:[#allocation2] sm:$0xf]  ;;  %v76_v1 = vld [vmem:[#allocation5] ss:$0 sm:$0xff] }
   0xc   :  { %v45_v2 = vadd.f32 %v76_v1, %v40_v0  ;;  %s159_s0 = smov [#allocation7]   ;;  %s62_s21 = sshll.u32 %s186_s2, 4  ;;  %s63_s21 = int_to_ptr.hbm [resolvable:$true] %s62_s21 }
   0xd   :  { %s60_s1 = sshll.u32 %s159_s0, 4  ;;  %s61_s1 = int_to_ptr.vmem [resolvable:$true] %s60_s1 }
   0xe   :  { %v46_v3 = vmul.f32 %v45_v2, %v45_v2  ;;  %v51_v7 = vmul.f32 0.5, %v45_v2 }
  0x10   :  { %v47_v4 = vmul.f32 0.035677407, %v46_v3 }
  0x12   :  { %v48_v5 = vadd.f32 0.7978846, %v47_v4 }
  0x14   :  { %v49_v6 = vmul.f32 %v48_v5, %v45_v2 }
  0x16   :  { %77 = vtanh.f32 %v49_v6 }
  0x1c   :  { %v78_v8 = vpop.eup %77 }
  0x1d   :  { %v52_v9 = vmul.f32 %v78_v8, %v51_v7 }
  0x1f   :  { %v53_v10 = vadd.f32 %v52_v9, %v51_v7 }
  0x21   :  { %54 = vst [vmem:[#allocation7] sm:$0xf] %v53_v10 }
  0x22   :  { %65 = dma.vmem_to_hbm [thread:$0]  %s61_s1, 64, %s63_s21, [#allocation4]  }
  0x23   :  { %155 = dma.done.wait [#allocation4], 64  }
  0x24   :  { %156 = vsyncadd [#allocation4], 4294967232 }
  0x25   :  { %70 = vsyncpa [#allocation3], 1 }
  0x26   :  { %71 = vsyncpa [#allocation6], 1 }
  0x27   :  { %72 = vsyncpa [#allocation4], 1 }

</bundles_post_ra>
